<compile_context>
chip_gen: v5e
topology: v5e:2x2
jax: 0.10.0
libtpu: 0.0.40
codegen_flags: <defaults>
</compile_context>

<pallas_src>
import jax
import jax.numpy as jnp
from jax import lax
from jax.experimental import pallas as pl
from jax.experimental.pallas import tpu as pltpu
import numpy as np


def _round_up(x: int, m: int) -> int:
    return ((x + m - 1) // m) * m


def _cdiv(a: int, b: int) -> int:
    return -(-a // b)


# ----------------------------------------------------------------------------
# Resident-path kernel: full x_shape / x_desc live in VMEM; negatives are
# gathered in-kernel via a one-hot matmul on the MXU (exact gather).
# ----------------------------------------------------------------------------
def _make_resident_kernel(true_b: int, tb: int, bp: int, needs_mask: bool, dtype):
    # f32 one-hot matmul must run at HIGHEST precision so the gathered rows are
    # bit-exact; bf16 operands already accumulate exactly in f32 on the MXU.
    prec = jax.lax.Precision.HIGHEST if jnp.dtype(dtype) == jnp.float32 else None

    def kernel(margin_ref, idx_d_ref, idx_s_ref, xs_full_ref, xd_full_ref, out_ref):
        margin = margin_ref[0]
        base = pl.multiple_of(pl.program_id(0) * tb, 8)

        # Anchor / positive tiles are sliced straight out of the resident arrays.
        xs = xs_full_ref[pl.ds(base, tb), :].astype(jnp.float32)   # (tb, Dp)
        xd = xd_full_ref[pl.ds(base, tb), :].astype(jnp.float32)   # (tb, Dp)

        # In-kernel gather of the hard negatives (one-hot rows x resident array).
        col = lax.broadcasted_iota(jnp.int32, (tb, bp), 1)
        p_d = (idx_d_ref[...] == col).astype(dtype)                # (tb, bp)
        p_s = (idx_s_ref[...] == col).astype(dtype)                # (tb, bp)
        nd = jnp.dot(p_d, xd_full_ref[...], precision=prec,
                     preferred_element_type=jnp.float32)           # x_desc[idx_d]
        ns = jnp.dot(p_s, xs_full_ref[...], precision=prec,
                     preferred_element_type=jnp.float32)           # x_shape[idx_s]

        d_pos = xs - xd
        pos = jnp.sum(d_pos * d_pos, axis=-1, keepdims=True)       # (tb, 1)
        d_n1 = xs - nd
        neg1 = jnp.sum(d_n1 * d_n1, axis=-1, keepdims=True)
        d_n2 = xd - ns
        neg2 = jnp.sum(d_n2 * d_n2, axis=-1, keepdims=True)

        # pos_red_1 == pos_red_2 (same squared difference), matching PyTorch.
        loss = (jnp.maximum(pos - neg1 + margin, 0.0)
                + jnp.maximum(pos - neg2 + margin, 0.0))

        if needs_mask:
            rows = base + lax.broadcasted_iota(jnp.int32, (tb, 1), 0)
            loss = jnp.where(rows < true_b, loss, 0.0)

        out_ref[...] = jnp.full(out_ref.shape, jnp.sum(loss), dtype=jnp.float32)

    return kernel


# ----------------------------------------------------------------------------
# Streaming-path kernel: negatives were pre-gathered in the wrapper; pure
# elementwise + lane-reduce over four streamed (TB, Dp) tiles.
# ----------------------------------------------------------------------------
def _make_streaming_kernel(true_b: int, tb: int, needs_mask: bool):
    def kernel(margin_ref, xs_ref, xd_ref, nd_ref, ns_ref, out_ref):
        margin = margin_ref[0]

        xs = xs_ref[...].astype(jnp.float32)
        xd = xd_ref[...].astype(jnp.float32)
        nd = nd_ref[...].astype(jnp.float32)
        ns = ns_ref[...].astype(jnp.float32)

        d_pos = xs - xd
        pos = jnp.sum(d_pos * d_pos, axis=-1, keepdims=True)
        d_n1 = xs - nd
        neg1 = jnp.sum(d_n1 * d_n1, axis=-1, keepdims=True)
        d_n2 = xd - ns
        neg2 = jnp.sum(d_n2 * d_n2, axis=-1, keepdims=True)

        loss = (jnp.maximum(pos - neg1 + margin, 0.0)
                + jnp.maximum(pos - neg2 + margin, 0.0))

        if needs_mask:
            rows = (pl.program_id(0) * tb
                    + lax.broadcasted_iota(jnp.int32, (tb, 1), 0))
            loss = jnp.where(rows < true_b, loss, 0.0)

        out_ref[...] = jnp.full(out_ref.shape, jnp.sum(loss), dtype=jnp.float32)

    return kernel


def triplet_loss_hard_negative(x_shape, x_desc, batch_size, margin, hard_neg_ind,
                               *, force_streaming=False, stream_tile_rows=None):
    assert x_shape.shape == x_desc.shape and x_shape.ndim == 2
    B, D = x_shape.shape
    assert B == batch_size

    dtype = x_shape.dtype
    itemsize = jnp.dtype(dtype).itemsize
    row_align = max(8, 32 // max(1, itemsize))     # sublane packing: f32 8, bf16 16, i8 32
    Dp = _round_up(D, 128)                         # lane-dense last dim

    idx = jnp.reshape(hard_neg_ind, (-1,)).astype(jnp.int32)   # handles .squeeze()
    idx_d = idx[:B] - B                            # rows of x_desc (branch-1 negatives)
    idx_s = idx[B:]                                # rows of x_shape (branch-2 negatives)

    margin_arr = jnp.asarray(margin, dtype=jnp.float32).reshape((1,))

    if Dp != D:                                    # zero lanes add 0 to every squared diff
        dpad = ((0, 0), (0, Dp - D))
        x_shape = jnp.pad(x_shape, dpad)
        x_desc = jnp.pad(x_desc, dpad)

    # ------------------------- resident (in-kernel gather) path -------------------------
    B_align = _round_up(B, row_align)
    if B_align >= 2 * row_align:                   # force >= 2 grid steps (v7x megacore)
        TB_r = _round_up((B_align + 1) // 2, row_align)
        Bp_r = 2 * TB_r
    else:
        TB_r = Bp_r = B_align
    resident_vmem = (2 * 2 * Bp_r * Dp * itemsize  # 2 resident operands (double-buffered)
                     + 2 * TB_r * Bp_r * 4         # one-hot gather matrices
                     + 8 * TB_r * Dp * 4           # f32 tiles / diffs
                     + (2 << 20))
    # Above ~1K rows the O(B^2 D) one-hot matmul would dominate the HBM savings;
    # fall back to the streaming path there (a true vectorized in-kernel gather
    # would need lax.gather lowering support, which we intentionally avoid).
    use_resident = (not force_streaming) and (Bp_r <= 1024) and (resident_vmem <= (36 << 20))

    if use_resident:
        G = Bp_r // TB_r
        pad_r = Bp_r - B
        if pad_r:
            x_shape_p = jnp.pad(x_shape, ((0, pad_r), (0, 0)))
            x_desc_p = jnp.pad(x_desc, ((0, pad_r), (0, 0)))
            idx_d_p = jnp.pad(idx_d, (0, pad_r))
            idx_s_p = jnp.pad(idx_s, (0, pad_r))
        else:
            x_shape_p, x_desc_p, idx_d_p, idx_s_p = x_shape, x_desc, idx_d, idx_s
        idx_d_p = idx_d_p.reshape(Bp_r, 1)
        idx_s_p = idx_s_p.reshape(Bp_r, 1)

        kernel = _make_resident_kernel(true_b=B, tb=TB_r, bp=Bp_r,
                                       needs_mask=(Bp_r != B), dtype=dtype)
        vmem_bytes = int(min(max(resident_vmem + (4 << 20), 16 << 20), 40 << 20))
        ce = pl.CostEstimate(
            flops=int(4 * Bp_r * Bp_r * Dp + 10 * Bp_r * Dp),
            transcendentals=0,
            bytes_accessed=int(2 * Bp_r * Dp * itemsize + 8 * Bp_r + G * 512 + 8),
        )
        full_spec = pl.BlockSpec((Bp_r, Dp), lambda i: (0, 0))   # VMEM-resident operands
        idx_spec = pl.BlockSpec((TB_r, 1), lambda i: (i, 0))

        partials = pl.pallas_call(
            kernel,
            out_shape=jax.ShapeDtypeStruct((G, 1, 128), jnp.float32),
            grid=(G,),
            in_specs=[
                pl.BlockSpec(memory_space=pltpu.MemorySpace.SMEM),   # margin (1,)
                idx_spec,                                            # idx into x_desc
                idx_spec,                                            # idx into x_shape
                full_spec,                                           # x_shape (resident)
                full_spec,                                           # x_desc  (resident)
            ],
            out_specs=pl.BlockSpec((1, 1, 128), lambda i: (i, 0, 0)),
            compiler_params=pltpu.CompilerParams(
                dimension_semantics=("parallel",),
                vmem_limit_bytes=vmem_bytes,
            ),
            cost_estimate=ce,
        )(margin_arr, idx_d_p, idx_s_p, x_shape_p, x_desc_p)
        return jnp.sum(partials[:, 0, 0])

    # ------------------------- streaming (pre-gather) fallback path ---------------------
    neg_d = jnp.take(x_desc, idx_d, axis=0)        # x_desc[hard_neg_ind[:B] - B]
    neg_s = jnp.take(x_shape, idx_s, axis=0)       # x_shape[hard_neg_ind[B:]]

    if stream_tile_rows is None:
        # ~2 MiB (f32-equivalent) per-operand tiles; split the batch near-evenly.
        cap_rows = max(row_align, ((512 * 1024) // Dp) // row_align * row_align)
        steps = max(1, _cdiv(B, cap_rows))
        TB = _round_up(_cdiv(B, steps), row_align)
    else:
        TB = int(stream_tile_rows)
    assert TB % row_align == 0, "tile rows must respect the dtype's sublane packing"
    Bp = _round_up(B, TB)
    G = Bp // TB
    if Bp != B:
        pad = ((0, Bp - B), (0, 0))
        x_shape_p = jnp.pad(x_shape, pad)
        x_desc_p = jnp.pad(x_desc, pad)
        neg_d = jnp.pad(neg_d, pad)
        neg_s = jnp.pad(neg_s, pad)
    else:
        x_shape_p, x_desc_p = x_shape, x_desc

    in_tile_bytes = TB * Dp * itemsize
    vmem_bytes = int(min(max(4 * 2 * in_tile_bytes + 4 * TB * Dp * 4 + (4 << 20),
                             16 << 20), 40 << 20))
    ce = pl.CostEstimate(flops=int(10 * Bp * Dp), transcendentals=0,
                         bytes_accessed=int(4 * Bp * Dp * itemsize + G * 512 + 8))
    data_spec = pl.BlockSpec((TB, Dp), lambda i: (i, 0))
    kernel = _make_streaming_kernel(true_b=B, tb=TB, needs_mask=(Bp != B))

    partials = pl.pallas_call(
        kernel,
        out_shape=jax.ShapeDtypeStruct((G, 1, 128), jnp.float32),
        grid=(G,),
        in_specs=[
            pl.BlockSpec(memory_space=pltpu.MemorySpace.SMEM),       # margin (1,)
            data_spec,                                               # x_shape
            data_spec,                                               # x_desc
            data_spec,                                               # gathered neg (desc)
            data_spec,                                               # gathered neg (shape)
        ],
        out_specs=pl.BlockSpec((1, 1, 128), lambda i: (i, 0, 0)),
        compiler_params=pltpu.CompilerParams(
            dimension_semantics=("parallel",),
            vmem_limit_bytes=vmem_bytes,
        ),
        cost_estimate=ce,
    )(margin_arr, x_shape_p, x_desc_p, neg_d, neg_s)
    return jnp.sum(partials[:, 0, 0])


def _reference(x_shape, x_desc, batch_size, margin, hard_neg_ind):
    x_shape = x_shape.astype(jnp.float32)
    x_desc = x_desc.astype(jnp.float32)
    hni = jnp.reshape(hard_neg_ind, (-1,))
    neg_d_idx = hni[:batch_size] - batch_size
    neg_s_idx = hni[batch_size:]
    pos1 = jnp.sum((x_shape - x_desc) ** 2, axis=1)
    neg1 = jnp.sum((x_shape - x_desc[neg_d_idx]) ** 2, axis=1)
    pos2 = jnp.sum((x_desc - x_shape) ** 2, axis=1)
    neg2 = jnp.sum((x_desc - x_shape[neg_s_idx]) ** 2, axis=1)
    return (jnp.sum(jax.nn.relu(pos1 - neg1 + margin))
            + jnp.sum(jax.nn.relu(pos2 - neg2 + margin)))


def _make_indices(key_a, key_b, B):
    # First half: indices into the "desc" half of a concatenated batch, in [B, 2B).
    # Second half: indices into x_shape, in [0, B).
    ia = jax.random.randint(key_a, (B, 1), B, 2 * B, dtype=jnp.int32)
    ib = jax.random.randint(key_b, (B, 1), 0, B, dtype=jnp.int32)
    return jnp.concatenate([ia, ib], axis=0)


if __name__ == "__main__":
    key = jax.random.PRNGKey(0)
    k1, k2, k3, k4, k5, k6, k7, k8 = jax.random.split(key, 8)

    # --- Case 1: small f32 batch, resident path, single grid step -------------
    B, D, margin = 8, 128, 1.0
    x_shape = jax.random.normal(k1, (B, D), dtype=jnp.float32)
    x_desc = jax.random.normal(k2, (B, D), dtype=jnp.float32)
    hni = _make_indices(k3, k4, B)
    loss = jax.block_until_ready(
        triplet_loss_hard_negative(x_shape, x_desc, B, margin, hni))
    ref = _reference(x_shape, x_desc, B, margin, hni)
    np.testing.assert_allclose(np.asarray(loss), np.asarray(ref), rtol=1e-4, atol=1e-4)

    # --- Case 2: bf16, ragged batch, non-128 D, resident path, 2 grid steps ---
    B2, D2, margin2 = 20, 200, 0.5
    x_shape2 = jax.random.normal(k5, (B2, D2), dtype=jnp.float32).astype(jnp.bfloat16)
    x_desc2 = jax.random.normal(k6, (B2, D2), dtype=jnp.float32).astype(jnp.bfloat16)
    hni2 = _make_indices(k3, k4, B2)
    loss2 = jax.block_until_ready(
        triplet_loss_hard_negative(x_shape2, x_desc2, B2, margin2, hni2))
    ref2 = _reference(x_shape2, x_desc2, B2, margin2, hni2)
    np.testing.assert_allclose(np.asarray(loss2), np.asarray(ref2), rtol=1e-4, atol=1e-4)

    # --- Case 3: streaming fallback path (forced), ragged + masked tiles ------
    B3, D3, margin3 = 24, 160, 0.75
    x_shape3 = jax.random.normal(k7, (B3, D3), dtype=jnp.float32)
    x_desc3 = jax.random.normal(k8, (B3, D3), dtype=jnp.float32)
    hni3 = _make_indices(k3, k4, B3)
    loss3 = jax.block_until_ready(
        triplet_loss_hard_negative(x_shape3, x_desc3, B3, margin3, hni3,
                                   force_streaming=True, stream_tile_rows=16))
    ref3 = _reference(x_shape3, x_desc3, B3, margin3, hni3)
    np.testing.assert_allclose(np.asarray(loss3), np.asarray(ref3), rtol=1e-4, atol=1e-4)

    print("KERNEL_OK")
</pallas_src>

<mosaic_0001>
module attributes {stable_mosaic.version = 11 : i64} {
  func.func @kernel(%arg0: i32, %arg1: memref<1xf32, #tpu.memory_space<smem>>, %arg2: memref<8x1xi32, #tpu.memory_space<vmem>>, %arg3: memref<8x1xi32, #tpu.memory_space<vmem>>, %arg4: memref<8x128xf32, #tpu.memory_space<vmem>>, %arg5: memref<8x128xf32, #tpu.memory_space<vmem>>, %arg6: memref<1x1x128xf32, #tpu.memory_space<vmem>>) attributes {dimension_semantics = [#tpu.dimension_semantics<parallel>], iteration_bounds = array<i64: 1>, scalar_prefetch = 0 : i64, scratch_operands = 0 : i64, tpu.core_type = #tpu.core_type<tc>, window_params = [{transform_indices = @transform_0, window_bounds = array<i64: 1>}, {transform_indices = @transform_1, window_bounds = array<i64: 8, 1>}, {transform_indices = @transform_2, window_bounds = array<i64: 8, 1>}, {pipeline_mode = #tpu.pipeline_mode<synchronous>, transform_indices = @transform_3, window_bounds = array<i64: 8, 128>}, {pipeline_mode = #tpu.pipeline_mode<synchronous>, transform_indices = @transform_4, window_bounds = array<i64: 8, 128>}, {transform_indices = @transform_5, window_bounds = array<i64: 1, 1, 128>}]} {
    %c0 = arith.constant 0 : index
    %0 = memref.load %arg1[%c0] : memref<1xf32, #tpu.memory_space<smem>>
    %c8_i32 = arith.constant 8 : i32
    %1 = arith.muli %arg0, %c8_i32 : i32
    %2 = tpu.assume_multiple %1, 8 : i32
    %3 = arith.index_cast %2 : i32 to index
    %c0_0 = arith.constant 0 : index
    %4 = vector.load %arg4[%3, %c0_0] : memref<8x128xf32, #tpu.memory_space<vmem>>, vector<8x128xf32>
    %5 = arith.index_cast %2 : i32 to index
    %c0_1 = arith.constant 0 : index
    %6 = vector.load %arg5[%5, %c0_1] : memref<8x128xf32, #tpu.memory_space<vmem>>, vector<8x128xf32>
    %7 = tpu.iota {dimensions = array<i32: 1>} : vector<8x8xi32>
    %c0_2 = arith.constant 0 : index
    %c0_3 = arith.constant 0 : index
    %8 = vector.load %arg2[%c0_2, %c0_3] : memref<8x1xi32, #tpu.memory_space<vmem>>, vector<8x1xi32>
    %9 = vector.broadcast %8 : vector<8x1xi32> to vector<8x8xi32>
    %10 = arith.cmpi eq, %9, %7 : vector<8x8xi32>
    %11 = arith.extui %10 : vector<8x8xi1> to vector<8x8xi32>
    %12 = arith.sitofp %11 : vector<8x8xi32> to vector<8x8xf32>
    %c0_4 = arith.constant 0 : index
    %c0_5 = arith.constant 0 : index
    %13 = vector.load %arg3[%c0_4, %c0_5] : memref<8x1xi32, #tpu.memory_space<vmem>>, vector<8x1xi32>
    %14 = vector.broadcast %13 : vector<8x1xi32> to vector<8x8xi32>
    %15 = arith.cmpi eq, %14, %7 : vector<8x8xi32>
    %16 = arith.extui %15 : vector<8x8xi1> to vector<8x8xi32>
    %17 = arith.sitofp %16 : vector<8x8xi32> to vector<8x8xf32>
    %c0_6 = arith.constant 0 : index
    %c0_7 = arith.constant 0 : index
    %18 = vector.load %arg5[%c0_6, %c0_7] : memref<8x128xf32, #tpu.memory_space<vmem>>, vector<8x128xf32>
    %cst = arith.constant dense<0.000000e+00> : vector<8x128xf32>
    %19 = tpu.matmul %12, %18, %cst {dimension_numbers = #tpu.dot_dimension_numbers<[1], [0], [0], [1], [0, 0, 1, 1], [], []>, precision = #tpu.contract_precision<fp32>} : vector<8x8xf32>, vector<8x128xf32>, vector<8x128xf32> -> vector<8x128xf32>
    %c0_8 = arith.constant 0 : index
    %c0_9 = arith.constant 0 : index
    %20 = vector.load %arg4[%c0_8, %c0_9] : memref<8x128xf32, #tpu.memory_space<vmem>>, vector<8x128xf32>
    %cst_10 = arith.constant dense<0.000000e+00> : vector<8x128xf32>
    %21 = tpu.matmul %17, %20, %cst_10 {dimension_numbers = #tpu.dot_dimension_numbers<[1], [0], [0], [1], [0, 0, 1, 1], [], []>, precision = #tpu.contract_precision<fp32>} : vector<8x8xf32>, vector<8x128xf32>, vector<8x128xf32> -> vector<8x128xf32>
    %22 = arith.subf %4, %6 : vector<8x128xf32>
    %23 = arith.mulf %22, %22 : vector<8x128xf32>
    %cst_11 = arith.constant dense<0.000000e+00> : vector<8xf32>
    %24 = vector.multi_reduction <add>, %23, %cst_11 [1] : vector<8x128xf32> to vector<8xf32>
    %25 = vector.shape_cast %24 : vector<8xf32> to vector<8x1xf32>
    %26 = arith.subf %4, %19 : vector<8x128xf32>
    %27 = arith.mulf %26, %26 : vector<8x128xf32>
    %cst_12 = arith.constant dense<0.000000e+00> : vector<8xf32>
    %28 = vector.multi_reduction <add>, %27, %cst_12 [1] : vector<8x128xf32> to vector<8xf32>
    %29 = vector.shape_cast %28 : vector<8xf32> to vector<8x1xf32>
    %30 = arith.subf %6, %21 : vector<8x128xf32>
    %31 = arith.mulf %30, %30 : vector<8x128xf32>
    %cst_13 = arith.constant dense<0.000000e+00> : vector<8xf32>
    %32 = vector.multi_reduction <add>, %31, %cst_13 [1] : vector<8x128xf32> to vector<8xf32>
    %33 = vector.shape_cast %32 : vector<8xf32> to vector<8x1xf32>
    %34 = arith.subf %25, %29 : vector<8x1xf32>
    %35 = vector.broadcast %0 : f32 to vector<8x1xf32>
    %36 = arith.addf %34, %35 : vector<8x1xf32>
    %cst_14 = arith.constant 0.000000e+00 : f32
    %37 = vector.broadcast %cst_14 : f32 to vector<8x1xf32>
    %38 = arith.maximumf %36, %37 : vector<8x1xf32>
    %39 = arith.subf %25, %33 : vector<8x1xf32>
    %40 = vector.broadcast %0 : f32 to vector<8x1xf32>
    %41 = arith.addf %39, %40 : vector<8x1xf32>
    %cst_15 = arith.constant 0.000000e+00 : f32
    %42 = vector.broadcast %cst_15 : f32 to vector<8x1xf32>
    %43 = arith.maximumf %41, %42 : vector<8x1xf32>
    %44 = arith.addf %38, %43 : vector<8x1xf32>
    %45 = vector.shape_cast %44 : vector<8x1xf32> to vector<1x8x1xf32>
    %cst_16 = arith.constant dense<0.000000e+00> : vector<1xf32>
    %46 = vector.multi_reduction <add>, %45, %cst_16 [1, 2] : vector<1x8x1xf32> to vector<1xf32>
    %47 = vector.shape_cast %46 : vector<1xf32> to vector<1x1x1xf32>
    %48 = vector.extract %47[0, 0, 0] : f32 from vector<1x1x1xf32>
    %49 = vector.broadcast %48 : f32 to vector<1x1x128xf32>
    %c0_17 = arith.constant 0 : index
    %c0_18 = arith.constant 0 : index
    %c0_19 = arith.constant 0 : index
    %50 = vector.load %arg6[%c0_17, %c0_18, %c0_19] : memref<1x1x128xf32, #tpu.memory_space<vmem>>, vector<1x1x128xf32>
    tpu.vector_store %arg6[%c0_17, %c0_18, %c0_19], %49 {strides = array<i32>} : memref<1x1x128xf32, #tpu.memory_space<vmem>>, vector<1x1x128xf32>,
    return
  }
  func.func @transform_0(%arg0: i32) -> i32 {
    %c0_i32 = arith.constant 0 : i32
    %c0_i32_0 = arith.constant 0 : i32
    return %c0_i32 : i32
  }
  func.func @transform_1(%arg0: i32) -> (i32, i32) {
    %c0_i32 = arith.constant 0 : i32
    %c0_i32_0 = arith.constant 0 : i32
    return %arg0, %c0_i32 : i32, i32
  }
  func.func @transform_2(%arg0: i32) -> (i32, i32) {
    %c0_i32 = arith.constant 0 : i32
    %c0_i32_0 = arith.constant 0 : i32
    return %arg0, %c0_i32 : i32, i32
  }
  func.func @transform_3(%arg0: i32) -> (i32, i32) {
    %c0_i32 = arith.constant 0 : i32
    %c0_i32_0 = arith.constant 0 : i32
    %c0_i32_1 = arith.constant 0 : i32
    return %c0_i32, %c0_i32_0 : i32, i32
  }
  func.func @transform_4(%arg0: i32) -> (i32, i32) {
    %c0_i32 = arith.constant 0 : i32
    %c0_i32_0 = arith.constant 0 : i32
    %c0_i32_1 = arith.constant 0 : i32
    return %c0_i32, %c0_i32_0 : i32, i32
  }
  func.func @transform_5(%arg0: i32) -> (i32, i32, i32) {
    %c0_i32 = arith.constant 0 : i32
    %c0_i32_0 = arith.constant 0 : i32
    %c0_i32_1 = arith.constant 0 : i32
    return %arg0, %c0_i32, %c0_i32_0 : i32, i32, i32
  }
}

</mosaic_0001>

<bundles_post_ra>
// kernel: tpu_custom_call.1
= control target key start
LH: loop header
LB: loop body
LE: loop exit
PB: predicated region body
PF: predicated region fallthrough
CT: control target
= control target key end

     0   :  { %s499_s0 = inlined_call_operand.<no memory space> [shape: f32[1], index: 0, kind: input, shape index: {}]   ;;  %s500_s1 = inlined_call_operand.vmem [shape: s32[8,1], index: 1, kind: input, shape index: {}]   ;;  %s501_s2 = inlined_call_operand.vmem [shape: s32[8,1], index: 2, kind: input, shape index: {}]   ;;  %s502_s3 = inlined_call_operand.vmem [shape: f32[8,128], index: 3, kind: input, shape index: {}]   ;;  %s503_s4 = inlined_call_operand.vmem [shape: f32[8,128], index: 4, kind: input, shape index: {}]   ;;  %s504_s5 = inlined_call_operand.hbm [shape: f32[1,1,128], index: 5, kind: output, shape index: {}]  }
   0x1   :  { %v30_v0 = vld [vmem:[%s500_s1] sm:$0xff] }
   0x2   :  { %11 = vsyncpa [#allocation4], 0  ;;  %v434_v1 = vmov 0   ;;  %v37_v2 = vld [vmem:[%s501_s2] sm:$0xff]  ;;  %v28_v15 = vlaneseq  ;;  %vm45_vm0 = vcmask 64512   ;;  %v435_v18 = vmov 0.0  }
   0x3   :  { %407 = vset.pattern.permute.xlu0 %v434_v1  ;;  %v476_v3 = vld [vmem:[%s503_s4] sm:$0xff]  ;;  %v358_v63 = vstv %s499_s0  ;;  %vm365_vm3 = vcmask 7168   ;;  %s436_s24 = smov [#allocation3]   ;;  %s385_s27 = sshll.u32 %s504_s5, 4  ;;  %s386_s27 = int_to_ptr.hbm [resolvable:$true] %s385_s27 }
   0x4   :  { %32 = vperm.xlu0 %407, %v30_v0   ;;  %v64_v4 = vand.u32 4294901760, %v476_v3  ;;  %v195_v9 = vld [vmem:[%s502_s3] sm:$0xff]  ;;  %v29_v16 = vand.u32 127, %v28_v15  ;;  %s383_s0 = sshll.u32 %s436_s24, 4  ;;  %s384_s0 = int_to_ptr.vmem [resolvable:$true] %s383_s0 }
   0x5   :  { %v214_v10 = vand.u32 4294901760, %v195_v9  ;;  %v345_v32 = vsub.f32 %v195_v9, %v476_v3 }
   0x6   :  { %v91_v5 = vsub.f32 %v476_v3, %v64_v4  ;;  %141 = vmatpush.msra.mxu3 %v64_v4  ;;  %65 = vmatpush.msra.mxu0 %v64_v4 }
   0x7   :  { %v241_v11 = vsub.f32 %v195_v9, %v214_v10  ;;  %v346_v33 = vmul.f32 %v345_v32, %v345_v32 }
   0x8   :  { %v92_v6 = vand.u32 4294901760, %v91_v5  ;;  %118 = vmatpush.msra.mxu2 %v91_v5 }
   0x9   :  { %v242_v12 = vand.u32 4294901760, %v241_v11  ;;  %347 = vadd.xlane.f32.xlu1 %v346_v33 }
   0xa   :  { %v93_v7 = vsub.f32 %v91_v5, %v92_v6  ;;  %167 = vmatpush.msrb.mxu0 %v92_v6  ;;  %215 = vmatpush.msrb.mxu2 %v214_v10 }
   0xb   :  { %v243_v13 = vsub.f32 %v241_v11, %v242_v12 }
   0xc   :  { %39 = vperm.xlu0 %407, %v37_v2   ;;  %v94_v8 = vand.u32 4294901760, %v93_v7 }
   0xd   :  { %v244_v14 = vand.u32 4294901760, %v243_v13 }
   0xe   :  { %95 = vmatpush.msra.mxu1 %v94_v8 }
   0xf   :  { %245 = vmatpush.msrb.mxu3 %v244_v14 }
  0x10   :  { %189 = vmatpush.msrb.mxu1 %v64_v4 }
  0x76   :  { %v33_v17 = vpop.permute.xlu0 %32 }
  0x77   :  { %vm34_vm1 = vcmp.eq.s32.totalorder %v33_v17, %v29_v16 }
  0x78   :  { %v394_v19 = vsel %vm34_vm1, 1.0, %v435_v18 }
  0x79   :  { %396 = vmatmul.msk.f32.vlgmr.msra.gmra.mxu1 %vm45_vm0, %v394_v19  ;;  %v47_v20 = vsel %vm45_vm0, %v394_v19, 0 }
  0x7a   :  { %v67_v21 = vsub.f32 %v47_v20, %v47_v20  ;;  %291 = vmatpush.msra.mxu1 %v214_v10 }
  0x7c   :  { %121 = vmatmul.f32.vlgmr.msra.gmra.mxu2 %v67_v21  ;;  %v68_v22 = vand.u32 4294901760, %v67_v21  ;;  %v348_v60 = vpop.xlane.xlu1 %347 }
  0x7d   :  { %317 = vmatpush.msra.mxu2 %v242_v12 }
  0x7e   :  { %v40_v23 = vpop.permute.xlu0 %39  ;;  %145 = vmatmul.f32.vlgmr.msra.gmra.mxu3 %v68_v22  ;;  %v69_v24 = vsub.f32 %v67_v21, %v68_v22 }
  0x7f   :  { %vm41_vm2 = vcmp.eq.s32.totalorder %v40_v23, %v29_v16  ;;  %339 = vmatpush.msra.mxu3 %v214_v10 }
  0x80   :  { %v395_v25 = vsel %vm41_vm2, 1.0, %v435_v18  ;;  %v70_v26 = vand.u32 4294901760, %v69_v24 }
  0x81   :  { %v197_v27 = vsel %vm45_vm0, %v395_v25, 0  ;;  %398 = vmatmul.msk.f32.vlgmr.msrb.gmra.mxu1 %vm45_vm0, %v394_v19 }
  0x82   :  { %v217_v28 = vsub.f32 %v197_v27, %v197_v27  ;;  %71 = vmatmul.f32.vlgmr.msra.gmra.mxu0 %v70_v26 }
  0x83   :  { %268 = vmatpush.msra.mxu0 %v241_v11 }
  0x84   :  { %v218_v29 = vand.u32 4294901760, %v217_v28 }
  0x86   :  { %399 = vmatmul.msk.f32.vlgmr.msrb.gmra.mxu3 %vm45_vm0, %v395_v25  ;;  %v219_v30 = vsub.f32 %v217_v28, %v218_v29 }
  0x88   :  { %v220_v31 = vand.u32 4294901760, %v219_v30 }
  0x89   :  { %295 = vmatmul.f32.vlgmr.msra.gmra.mxu1 %v218_v29 }
  0x8a   :  { %397 = vmatmul.msk.f32.vlgmr.msrb.gmra.mxu0 %vm45_vm0, %v394_v19  ;;  %221 = vmatmul.f32.vlgmr.msrb.gmra.mxu2 %v220_v31 }
  0x8e   :  { %401 = vmatmul.msk.f32.vlgmr.msra.gmra.mxu3 %vm45_vm0, %v395_v25 }
  0x92   :  { %271 = vmatmul.f32.vlgmr.msra.gmra.mxu0 %v217_v28  ;;  %400 = vmatmul.msk.f32.vlgmr.msra.gmra.mxu2 %vm45_vm0, %v395_v25 }
  0xf6   :  { %v98_v34 = vpop.f32.mrf.mxu1 }
  0xfe   :  { %v192_v43 = vpop.f32.mrf.mxu1 }
  0xff   :  { %v72_v35 = vpop.f32.mrf.mxu0  ;;  %v122_v37 = vpop.f32.mrf.mxu2 }
 0x100   :  { %v99_v36 = vadd.f32 %v98_v34, %v72_v35 }
 0x101   :  { %v146_v39 = vpop.f32.mrf.mxu3 }
 0x102   :  { %v123_v38 = vadd.f32 %v122_v37, %v99_v36 }
 0x104   :  { %v147_v40 = vadd.f32 %v146_v39, %v123_v38 }
 0x106   :  { %v296_v52 = vpop.f32.mrf.mxu1 }
 0x107   :  { %v170_v41 = vpop.f32.mrf.mxu0 }
 0x108   :  { %v171_v42 = vadd.f32 %v170_v41, %v147_v40 }
 0x109   :  { %v248_v46 = vpop.f32.mrf.mxu3 }
 0x10a   :  { %v193_v44 = vadd.f32 %v192_v43, %v171_v42 }
 0x10c   :  { %v349_v45 = vsub.f32 %v195_v9, %v193_v44 }
 0x10d   :  { %v222_v47 = vpop.f32.mrf.mxu2 }
 0x10e   :  { %v249_v48 = vadd.f32 %v248_v46, %v222_v47  ;;  %v350_v49 = vmul.f32 %v349_v45, %v349_v45 }
 0x10f   :  { %v272_v50 = vpop.f32.mrf.mxu0 }
 0x110   :  { %v273_v51 = vadd.f32 %v272_v50, %v249_v48  ;;  %351 = vadd.xlane.f32.xlu1 %v350_v49 }
 0x111   :  { %v342_v56 = vpop.f32.mrf.mxu3 }
 0x112   :  { %v297_v53 = vadd.f32 %v296_v52, %v273_v51 }
 0x115   :  { %v320_v54 = vpop.f32.mrf.mxu2 }
 0x116   :  { %v321_v55 = vadd.f32 %v320_v54, %v297_v53 }
 0x118   :  { %v343_v57 = vadd.f32 %v342_v56, %v321_v55 }
 0x11a   :  { %v353_v58 = vsub.f32 %v476_v3, %v343_v57 }
 0x11c   :  { %v354_v59 = vmul.f32 %v353_v58, %v353_v58 }
 0x11e   :  { %355 = vadd.xlane.f32.xlu2 %v354_v59 }
 0x183   :  { %v352_v61 = vpop.xlane.xlu1 %351 }
 0x184   :  { %v357_v62 = vsub.f32 %v348_v60, %v352_v61 }
 0x186   :  { %v359_v1 = vadd.f32 %v358_v63, %v357_v62 }
 0x188   :  { %v360_v5 = vmax.f32 %v359_v1, 0.0 }
 0x191   :  { %v356_v0 = vpop.xlane.xlu2 %355 }
 0x192   :  { %v361_v2 = vsub.f32 %v348_v60, %v356_v0 }
 0x194   :  { %v362_v4 = vadd.f32 %v361_v2, %v358_v63 }
 0x196   :  { %v363_v6 = vmax.f32 %v362_v4, 0.0 }
 0x198   :  { %v364_v7 = vadd.f32 %v363_v6, %v360_v5 }
 0x19a   :  { %v366_v8 = vsel %vm365_vm3, %v364_v7, 0.0 }
 0x19b   :  { %367 = vadd.xlane.f32.xlu2 %v366_v8 }
 0x20e   :  { %v368_v3 = vpop.xlane.xlu2 %367 }
 0x20f   :  { %v369_v9 = vrot.slane %v368_v3, 4 }
 0x211   :  { %v370_v10 = vadd.f32 %v369_v9, %v368_v3 }
 0x213   :  { %v371_v11 = vrot.slane %v370_v10, 2 }
 0x215   :  { %v372_v12 = vadd.f32 %v371_v11, %v370_v10 }
 0x217   :  { %v373_v13 = vrot.slane %v372_v12, 1 }
 0x219   :  { %v374_v14 = vadd.f32 %v373_v13, %v372_v12 }
 0x21b   :  { %402 = vpush %v374_v14 }
 0x24c   :  { %s403_s28 = spop %402 }
 0x24d   :  { %v376_v15 = vstv %s403_s28 }
 0x24e   :  { %377 = vst [vmem:[#allocation3] sm:$0x1] %v376_v15 }
 0x24f   :  { %388 = dma.vmem_to_hbm [thread:$0]  %s384_s0, 16, %s386_s27, [#allocation4]  }
 0x250   :  { %432 = dma.done.wait [#allocation4], 16  }
 0x251   :  { %433 = vsyncadd [#allocation4], 4294967280 }
 0x252   :  { %393 = vsyncpa [#allocation4], 1 }

</bundles_post_ra>
